<compile_context>
chip_gen: v7x
topology: tpu7x:2x2x1
jax: 0.10.0
libtpu: 0.0.40
codegen_flags: <defaults>
</compile_context>

<pallas_src>
import functools
import math

import jax
import jax.numpy as jnp
from jax import lax
from jax.experimental import pallas as pl
from jax.experimental.pallas import tpu as pltpu


def _arc_margin_kernel(x_ref, wn_ref, label_ref, out_ref, loss_ref,
                       m_sc, l_sc, t_sc,
                       *, cos_m, sin_m, th, mm, scale, easy_margin, ls_eps,
                       n_classes, tn):
    j = pl.program_id(1)
    n_j = pl.num_programs(1)

    # ---- init online-softmax state at the first class tile -----------------
    @pl.when(j == 0)
    def _init():
        m_sc[...] = jnp.full_like(m_sc, -jnp.inf)
        l_sc[...] = jnp.zeros_like(l_sc)
        t_sc[...] = jnp.zeros_like(t_sc)

    # ---- normalize the input rows (F.normalize(input, dim=1)) --------------
    x = x_ref[...].astype(jnp.float32)                              # [TM, D]
    inv_nx = lax.rsqrt(jnp.maximum(jnp.sum(x * x, axis=1, keepdims=True),
                                   jnp.float32(1e-24)))             # EUP rsqrt
    xn = (x * inv_nx).astype(jnp.bfloat16)

    # ---- cosine tile on the MXU: bf16 inputs, f32 accumulation, no .T ------
    cosine = lax.dot_general(
        xn, wn_ref[...],
        dimension_numbers=(((1,), (1,)), ((), ())),
        preferred_element_type=jnp.float32)                         # [TM, TN]

    # ---- ArcFace margin -----------------------------------------------------
    sine = jnp.sqrt(jnp.clip(1.0 - cosine * cosine, 0.0, 1.0))
    phi = cosine * cos_m - sine * sin_m
    if easy_margin:
        phi = jnp.where(cosine > 0.0, phi, cosine)
    else:
        phi = jnp.where(cosine > th, phi, cosine - mm)

    # ---- one-hot for this class tile (iota offset by tile base) ------------
    label = label_ref[...]                                          # [TM, 1]
    tm = out_ref.shape[0]
    cls_ids = j * tn + lax.broadcasted_iota(jnp.int32, (tm, tn), 1)
    is_target = cls_ids == label                                    # [TM, TN]
    one_hot = is_target.astype(jnp.float32)
    if ls_eps > 0.0:
        one_hot = (1.0 - ls_eps) * one_hot + ls_eps / n_classes

    output = (one_hot * phi + (1.0 - one_hot) * cosine) * scale
    out_ref[...] = output

    # ---- online logsumexp + raw label-logit gather --------------------------
    m_prev = m_sc[...]
    m_new = jnp.maximum(m_prev, jnp.max(output, axis=1, keepdims=True))
    alpha = jnp.exp(m_prev - m_new)
    l_sc[...] = alpha * l_sc[...] + jnp.sum(jnp.exp(output - m_new),
                                            axis=1, keepdims=True)
    t_sc[...] = t_sc[...] + jnp.sum(jnp.where(is_target, output, 0.0),
                                    axis=1, keepdims=True)
    m_sc[...] = m_new

    # ---- finalize per-row CE at the last class tile -------------------------
    @pl.when(j == n_j - 1)
    def _finalize():
        loss_ref[...] = m_sc[...] + jnp.log(l_sc[...]) - t_sc[...]


def _pick_tile(dim, candidates):
    for c in candidates:
        if c <= dim and dim % c == 0:
            return c
    return dim  # fall back to the full extent (always legal for a BlockSpec)


def arc_margin_product(x, weight, label, *, scale=30.0, margin=0.5,
                       easy_margin=False, ls_eps=0.0,
                       block_b=None, block_c=None):
    """x: [B, D] f32, weight: [C, D] f32, label: [B] int -> (logits [B, C], loss scalar)."""
    B, D = x.shape
    C, D2 = weight.shape
    assert D == D2

    cos_m = math.cos(margin)
    sin_m = math.sin(margin)
    th = math.cos(math.pi - margin)
    mm = math.sin(math.pi - margin) * margin

    tm = block_b if block_b is not None else _pick_tile(B, (256, 128, 64, 32, 16, 8))
    tn = block_c if block_c is not None else _pick_tile(C, (2048, 1024, 512, 256, 128))
    assert B % tm == 0 and C % tn == 0

    # Normalize the class-weight rows ONCE (single pass over W) and stream bf16.
    w32 = weight.astype(jnp.float32)
    wn = w32 * lax.rsqrt(jnp.maximum(jnp.sum(w32 * w32, axis=1, keepdims=True),
                                     jnp.float32(1e-24)))
    wn = wn.astype(jnp.bfloat16)

    label2d = label.astype(jnp.int32).reshape(B, 1)

    kernel = functools.partial(
        _arc_margin_kernel,
        cos_m=cos_m, sin_m=sin_m, th=th, mm=mm, scale=scale,
        easy_margin=easy_margin, ls_eps=ls_eps, n_classes=C, tn=tn)

    grid = (B // tm, C // tn)

    logits, loss_rows = pl.pallas_call(
        kernel,
        out_shape=(
            jax.ShapeDtypeStruct((B, C), jnp.float32),
            jax.ShapeDtypeStruct((B, 1), jnp.float32),
        ),
        grid_spec=pltpu.PrefetchScalarGridSpec(
            num_scalar_prefetch=0,
            grid=grid,
            in_specs=[
                pl.BlockSpec((tm, D), lambda i, j: (i, 0)),   # x tile
                pl.BlockSpec((tn, D), lambda i, j: (j, 0)),   # bf16 weight tile
                pl.BlockSpec((tm, 1), lambda i, j: (i, 0)),   # labels
            ],
            out_specs=(
                pl.BlockSpec((tm, tn), lambda i, j: (i, j)),  # logits tile
                pl.BlockSpec((tm, 1), lambda i, j: (i, 0)),   # per-row CE loss
            ),
            scratch_shapes=[
                pltpu.VMEM((tm, 1), jnp.float32),  # running max
                pltpu.VMEM((tm, 1), jnp.float32),  # running sum-exp
                pltpu.VMEM((tm, 1), jnp.float32),  # gathered label logit
            ],
        ),
        compiler_params=pltpu.CompilerParams(
            dimension_semantics=("parallel", "arbitrary"),
            vmem_limit_bytes=32 * 1024 * 1024,
        ),
    )(x.astype(jnp.float32), wn, label2d)

    # Tiny final reduction outside the kernel keeps the batch axis "parallel".
    loss = jnp.mean(loss_rows)
    return logits, loss


def init_arc_margin_weight(key, in_features, out_features):
    """nn.init.xavier_uniform_ on a (out_features, in_features) matrix."""
    bound = math.sqrt(6.0 / (in_features + out_features))
    return jax.random.uniform(
        key, (out_features, in_features), dtype=jnp.float32,
        minval=-bound, maxval=bound)


def _reference(x, weight, label, *, scale, margin, easy_margin, ls_eps):
    """Pure-JAX ArcFace reference (bf16-matched matmul inputs, f32 math)."""
    cos_m = math.cos(margin)
    sin_m = math.sin(margin)
    th = math.cos(math.pi - margin)
    mm = math.sin(math.pi - margin) * margin
    xn = x * lax.rsqrt(jnp.maximum(jnp.sum(x * x, axis=1, keepdims=True), 1e-24))
    wn = weight * lax.rsqrt(jnp.maximum(jnp.sum(weight * weight, axis=1,
                                                keepdims=True), 1e-24))
    xn = xn.astype(jnp.bfloat16).astype(jnp.float32)
    wn = wn.astype(jnp.bfloat16).astype(jnp.float32)
    cosine = xn @ wn.T
    sine = jnp.sqrt(jnp.clip(1.0 - cosine * cosine, 0.0, 1.0))
    phi = cosine * cos_m - sine * sin_m
    if easy_margin:
        phi = jnp.where(cosine > 0.0, phi, cosine)
    else:
        phi = jnp.where(cosine > th, phi, cosine - mm)
    C = weight.shape[0]
    one_hot = jax.nn.one_hot(label, C, dtype=jnp.float32)
    oh = (1.0 - ls_eps) * one_hot + ls_eps / C if ls_eps > 0 else one_hot
    out = (oh * phi + (1.0 - oh) * cosine) * scale
    lse = jax.scipy.special.logsumexp(out, axis=1)
    tgt = jnp.take_along_axis(out, label[:, None], axis=1)[:, 0]
    return out, jnp.mean(lse - tgt)


if __name__ == "__main__":
    key = jax.random.PRNGKey(0)
    k_x, k_w, k_l = jax.random.split(key, 3)

    # Small demo shapes chosen so the grid is actually exercised:
    # grid = (B/TM, C/TN) = (2, 3) with TM=8, TN=128.
    B, in_features, out_features = 16, 128, 384
    x = jax.random.normal(k_x, (B, in_features), dtype=jnp.float32)
    weight = init_arc_margin_weight(k_w, in_features, out_features)
    label = jax.random.randint(k_l, (B,), 0, out_features, dtype=jnp.int32)

    logits, loss = arc_margin_product(x, weight, label,
                                      scale=30.0, margin=0.5,
                                      easy_margin=False, ls_eps=0.0,
                                      block_b=8, block_c=128)
    jax.block_until_ready((logits, loss))

    assert logits.shape == (B, out_features)
    assert loss.shape == ()
    assert bool(jnp.isfinite(loss))
    assert bool(jnp.all(jnp.isfinite(logits)))

    ref_logits, ref_loss = _reference(x, weight, label, scale=30.0, margin=0.5,
                                      easy_margin=False, ls_eps=0.0)
    assert bool(jnp.allclose(logits, ref_logits, atol=5e-3, rtol=1e-3)), \
        float(jnp.max(jnp.abs(logits - ref_logits)))
    assert bool(jnp.allclose(loss, ref_loss, atol=1e-3, rtol=1e-3)), \
        (float(loss), float(ref_loss))

    print("KERNEL_OK")
</pallas_src>

<mosaic_0001>
module attributes {stable_mosaic.version = 11 : i64} {
  func.func @_arc_margin_kernel(%arg0: i32, %arg1: i32, %arg2: memref<8x128xf32, #tpu.memory_space<vmem>>, %arg3: memref<128x128xbf16, #tpu.memory_space<vmem>>, %arg4: memref<8x1xi32, #tpu.memory_space<vmem>>, %arg5: memref<8x128xf32, #tpu.memory_space<vmem>>, %arg6: memref<8x1xf32, #tpu.memory_space<vmem>>, %arg7: memref<8x1xf32, #tpu.memory_space<vmem>>, %arg8: memref<8x1xf32, #tpu.memory_space<vmem>>, %arg9: memref<8x1xf32, #tpu.memory_space<vmem>>) attributes {dimension_semantics = [#tpu.dimension_semantics<parallel>, #tpu.dimension_semantics<arbitrary>], iteration_bounds = array<i64: 2, 3>, scalar_prefetch = 0 : i64, scratch_operands = 3 : i64, tpu.core_type = #tpu.core_type<tc>, window_params = [{transform_indices = @transform_0, window_bounds = array<i64: 8, 128>}, {transform_indices = @transform_1, window_bounds = array<i64: 128, 128>}, {transform_indices = @transform_2, window_bounds = array<i64: 8, 1>}, {transform_indices = @transform_3, window_bounds = array<i64: 8, 128>}, {transform_indices = @transform_4, window_bounds = array<i64: 8, 1>}]} {
    %c0_i32 = arith.constant 0 : i32
    %0 = arith.cmpi eq, %arg1, %c0_i32 : i32
    %1 = arith.extui %0 : i1 to i32
    %c0_i32_0 = arith.constant 0 : i32
    %2 = arith.cmpi ne, %1, %c0_i32_0 : i32
    scf.if %2 {
      %cst_36 = arith.constant 0xFF800000 : f32
      %76 = vector.broadcast %cst_36 : f32 to vector<8x1xf32>
      %c0_37 = arith.constant 0 : index
      %c0_38 = arith.constant 0 : index
      %77 = vector.load %arg7[%c0_37, %c0_38] : memref<8x1xf32, #tpu.memory_space<vmem>>, vector<8x1xf32>
      tpu.vector_store %arg7[%c0_37, %c0_38], %76 {strides = array<i32>} : memref<8x1xf32, #tpu.memory_space<vmem>>, vector<8x1xf32>,
      %cst_39 = arith.constant 0.000000e+00 : f32
      %78 = vector.broadcast %cst_39 : f32 to vector<8x1xf32>
      %c0_40 = arith.constant 0 : index
      %c0_41 = arith.constant 0 : index
      %79 = vector.load %arg8[%c0_40, %c0_41] : memref<8x1xf32, #tpu.memory_space<vmem>>, vector<8x1xf32>
      tpu.vector_store %arg8[%c0_40, %c0_41], %78 {strides = array<i32>} : memref<8x1xf32, #tpu.memory_space<vmem>>, vector<8x1xf32>,
      %cst_42 = arith.constant 0.000000e+00 : f32
      %80 = vector.broadcast %cst_42 : f32 to vector<8x1xf32>
      %c0_43 = arith.constant 0 : index
      %c0_44 = arith.constant 0 : index
      %81 = vector.load %arg9[%c0_43, %c0_44] : memref<8x1xf32, #tpu.memory_space<vmem>>, vector<8x1xf32>
      tpu.vector_store %arg9[%c0_43, %c0_44], %80 {strides = array<i32>} : memref<8x1xf32, #tpu.memory_space<vmem>>, vector<8x1xf32>,
    } else {
    }
    %c0 = arith.constant 0 : index
    %c0_1 = arith.constant 0 : index
    %3 = vector.load %arg2[%c0, %c0_1] : memref<8x128xf32, #tpu.memory_space<vmem>>, vector<8x128xf32>
    %4 = arith.mulf %3, %3 : vector<8x128xf32>
    %cst = arith.constant dense<0.000000e+00> : vector<8xf32>
    %5 = vector.multi_reduction <add>, %4, %cst [1] : vector<8x128xf32> to vector<8xf32>
    %6 = vector.shape_cast %5 : vector<8xf32> to vector<8x1xf32>
    %cst_2 = arith.constant 1.000000e-24 : f32
    %7 = vector.broadcast %cst_2 : f32 to vector<8x1xf32>
    %8 = arith.maximumf %6, %7 : vector<8x1xf32>
    %9 = math.rsqrt %8 : vector<8x1xf32>
    %10 = vector.broadcast %9 : vector<8x1xf32> to vector<8x128xf32>
    %11 = arith.mulf %3, %10 : vector<8x128xf32>
    %12 = arith.truncf %11 : vector<8x128xf32> to vector<8x128xbf16>
    %c0_3 = arith.constant 0 : index
    %c0_4 = arith.constant 0 : index
    %13 = vector.load %arg3[%c0_3, %c0_4] : memref<128x128xbf16, #tpu.memory_space<vmem>>, vector<128x128xbf16>
    %cst_5 = arith.constant dense<0.000000e+00> : vector<8x128xf32>
    %14 = tpu.matmul %12, %13, %cst_5 {dimension_numbers = #tpu.dot_dimension_numbers<[1], [1], [0], [0], [0, 0, 1, 0], [], []>} : vector<8x128xbf16>, vector<128x128xbf16>, vector<8x128xf32> -> vector<8x128xf32>
    %15 = arith.mulf %14, %14 : vector<8x128xf32>
    %cst_6 = arith.constant 1.000000e+00 : f32
    %16 = vector.broadcast %cst_6 : f32 to vector<8x128xf32>
    %17 = arith.subf %16, %15 : vector<8x128xf32>
    %cst_7 = arith.constant 0.000000e+00 : f32
    %cst_8 = arith.constant 1.000000e+00 : f32
    %18 = vector.broadcast %cst_7 : f32 to vector<8x128xf32>
    %19 = arith.maximumf %18, %17 : vector<8x128xf32>
    %20 = vector.broadcast %cst_8 : f32 to vector<8x128xf32>
    %21 = arith.minimumf %20, %19 : vector<8x128xf32>
    %22 = math.sqrt %21 : vector<8x128xf32>
    %cst_9 = arith.constant 0.87758255 : f32
    %23 = vector.broadcast %cst_9 : f32 to vector<8x128xf32>
    %24 = arith.mulf %14, %23 : vector<8x128xf32>
    %cst_10 = arith.constant 0.47942555 : f32
    %25 = vector.broadcast %cst_10 : f32 to vector<8x128xf32>
    %26 = arith.mulf %22, %25 : vector<8x128xf32>
    %27 = arith.subf %24, %26 : vector<8x128xf32>
    %cst_11 = arith.constant -0.87758255 : f32
    %28 = vector.broadcast %cst_11 : f32 to vector<8x128xf32>
    %29 = arith.cmpf ogt, %14, %28 : vector<8x128xf32>
    %cst_12 = arith.constant 0.239712775 : f32
    %30 = vector.broadcast %cst_12 : f32 to vector<8x128xf32>
    %31 = arith.subf %14, %30 : vector<8x128xf32>
    %32 = arith.select %29, %27, %31 : vector<8x128xi1>, vector<8x128xf32>
    %c0_13 = arith.constant 0 : index
    %c0_14 = arith.constant 0 : index
    %33 = vector.load %arg4[%c0_13, %c0_14] : memref<8x1xi32, #tpu.memory_space<vmem>>, vector<8x1xi32>
    %c128_i32 = arith.constant 128 : i32
    %34 = arith.muli %arg1, %c128_i32 : i32
    %35 = tpu.iota {dimensions = array<i32: 1>} : vector<8x128xi32>
    %36 = vector.broadcast %34 : i32 to vector<8x128xi32>
    %37 = arith.addi %36, %35 : vector<8x128xi32>
    %38 = vector.broadcast %33 : vector<8x1xi32> to vector<8x128xi32>
    %39 = arith.cmpi eq, %37, %38 : vector<8x128xi32>
    %40 = arith.extui %39 : vector<8x128xi1> to vector<8x128xi32>
    %41 = arith.sitofp %40 : vector<8x128xi32> to vector<8x128xf32>
    %42 = arith.mulf %41, %32 : vector<8x128xf32>
    %cst_15 = arith.constant 1.000000e+00 : f32
    %43 = vector.broadcast %cst_15 : f32 to vector<8x128xf32>
    %44 = arith.subf %43, %41 : vector<8x128xf32>
    %45 = arith.mulf %44, %14 : vector<8x128xf32>
    %46 = arith.addf %42, %45 : vector<8x128xf32>
    %cst_16 = arith.constant 3.000000e+01 : f32
    %47 = vector.broadcast %cst_16 : f32 to vector<8x128xf32>
    %48 = arith.mulf %46, %47 : vector<8x128xf32>
    %c0_17 = arith.constant 0 : index
    %c0_18 = arith.constant 0 : index
    %49 = vector.load %arg5[%c0_17, %c0_18] : memref<8x128xf32, #tpu.memory_space<vmem>>, vector<8x128xf32>
    tpu.vector_store %arg5[%c0_17, %c0_18], %48 {strides = array<i32>} : memref<8x128xf32, #tpu.memory_space<vmem>>, vector<8x128xf32>,
    %c0_19 = arith.constant 0 : index
    %c0_20 = arith.constant 0 : index
    %50 = vector.load %arg7[%c0_19, %c0_20] : memref<8x1xf32, #tpu.memory_space<vmem>>, vector<8x1xf32>
    %cst_21 = arith.constant dense<0xFF800000> : vector<8xf32>
    %51 = vector.multi_reduction <maximumf>, %48, %cst_21 [1] : vector<8x128xf32> to vector<8xf32>
    %52 = vector.shape_cast %51 : vector<8xf32> to vector<8x1xf32>
    %53 = arith.maximumf %50, %52 : vector<8x1xf32>
    %54 = arith.subf %50, %53 : vector<8x1xf32>
    %55 = math.exp %54 : vector<8x1xf32>
    %c0_22 = arith.constant 0 : index
    %c0_23 = arith.constant 0 : index
    %56 = vector.load %arg8[%c0_22, %c0_23] : memref<8x1xf32, #tpu.memory_space<vmem>>, vector<8x1xf32>
    %57 = arith.mulf %55, %56 : vector<8x1xf32>
    %58 = vector.broadcast %53 : vector<8x1xf32> to vector<8x128xf32>
    %59 = arith.subf %48, %58 : vector<8x128xf32>
    %60 = math.exp %59 : vector<8x128xf32>
    %cst_24 = arith.constant dense<0.000000e+00> : vector<8xf32>
    %61 = vector.multi_reduction <add>, %60, %cst_24 [1] : vector<8x128xf32> to vector<8xf32>
    %62 = vector.shape_cast %61 : vector<8xf32> to vector<8x1xf32>
    %63 = arith.addf %57, %62 : vector<8x1xf32>
    %c0_25 = arith.constant 0 : index
    %c0_26 = arith.constant 0 : index
    %64 = vector.load %arg8[%c0_25, %c0_26] : memref<8x1xf32, #tpu.memory_space<vmem>>, vector<8x1xf32>
    tpu.vector_store %arg8[%c0_25, %c0_26], %63 {strides = array<i32>} : memref<8x1xf32, #tpu.memory_space<vmem>>, vector<8x1xf32>,
    %c0_27 = arith.constant 0 : index
    %c0_28 = arith.constant 0 : index
    %65 = vector.load %arg9[%c0_27, %c0_28] : memref<8x1xf32, #tpu.memory_space<vmem>>, vector<8x1xf32>
    %cst_29 = arith.constant 0.000000e+00 : f32
    %66 = vector.broadcast %cst_29 : f32 to vector<8x128xf32>
    %67 = arith.select %39, %48, %66 : vector<8x128xi1>, vector<8x128xf32>
    %cst_30 = arith.constant dense<0.000000e+00> : vector<8xf32>
    %68 = vector.multi_reduction <add>, %67, %cst_30 [1] : vector<8x128xf32> to vector<8xf32>
    %69 = vector.shape_cast %68 : vector<8xf32> to vector<8x1xf32>
    %70 = arith.addf %65, %69 : vector<8x1xf32>
    %c0_31 = arith.constant 0 : index
    %c0_32 = arith.constant 0 : index
    %71 = vector.load %arg9[%c0_31, %c0_32] : memref<8x1xf32, #tpu.memory_space<vmem>>, vector<8x1xf32>
    tpu.vector_store %arg9[%c0_31, %c0_32], %70 {strides = array<i32>} : memref<8x1xf32, #tpu.memory_space<vmem>>, vector<8x1xf32>,
    %c0_33 = arith.constant 0 : index
    %c0_34 = arith.constant 0 : index
    %72 = vector.load %arg7[%c0_33, %c0_34] : memref<8x1xf32, #tpu.memory_space<vmem>>, vector<8x1xf32>
    tpu.vector_store %arg7[%c0_33, %c0_34], %53 {strides = array<i32>} : memref<8x1xf32, #tpu.memory_space<vmem>>, vector<8x1xf32>,
    %c2_i32 = arith.constant 2 : i32
    %73 = arith.cmpi eq, %arg1, %c2_i32 : i32
    %74 = arith.extui %73 : i1 to i32
    %c0_i32_35 = arith.constant 0 : i32
    %75 = arith.cmpi ne, %74, %c0_i32_35 : i32
    scf.if %75 {
      %c0_36 = arith.constant 0 : index
      %c0_37 = arith.constant 0 : index
      %76 = vector.load %arg7[%c0_36, %c0_37] : memref<8x1xf32, #tpu.memory_space<vmem>>, vector<8x1xf32>
      %c0_38 = arith.constant 0 : index
      %c0_39 = arith.constant 0 : index
      %77 = vector.load %arg8[%c0_38, %c0_39] : memref<8x1xf32, #tpu.memory_space<vmem>>, vector<8x1xf32>
      %78 = math.log %77 : vector<8x1xf32>
      %79 = arith.addf %76, %78 : vector<8x1xf32>
      %c0_40 = arith.constant 0 : index
      %c0_41 = arith.constant 0 : index
      %80 = vector.load %arg9[%c0_40, %c0_41] : memref<8x1xf32, #tpu.memory_space<vmem>>, vector<8x1xf32>
      %81 = arith.subf %79, %80 : vector<8x1xf32>
      %c0_42 = arith.constant 0 : index
      %c0_43 = arith.constant 0 : index
      %82 = vector.load %arg6[%c0_42, %c0_43] : memref<8x1xf32, #tpu.memory_space<vmem>>, vector<8x1xf32>
      tpu.vector_store %arg6[%c0_42, %c0_43], %81 {strides = array<i32>} : memref<8x1xf32, #tpu.memory_space<vmem>>, vector<8x1xf32>,
    } else {
    }
    return
  }
  func.func @transform_0(%arg0: i32, %arg1: i32) -> (i32, i32) {
    %c0_i32 = arith.constant 0 : i32
    %c0_i32_0 = arith.constant 0 : i32
    return %arg0, %c0_i32 : i32, i32
  }
  func.func @transform_1(%arg0: i32, %arg1: i32) -> (i32, i32) {
    %c0_i32 = arith.constant 0 : i32
    %c0_i32_0 = arith.constant 0 : i32
    return %arg1, %c0_i32 : i32, i32
  }
  func.func @transform_2(%arg0: i32, %arg1: i32) -> (i32, i32) {
    %c0_i32 = arith.constant 0 : i32
    %c0_i32_0 = arith.constant 0 : i32
    return %arg0, %c0_i32 : i32, i32
  }
  func.func @transform_3(%arg0: i32, %arg1: i32) -> (i32, i32) {
    %c0_i32 = arith.constant 0 : i32
    return %arg0, %arg1 : i32, i32
  }
  func.func @transform_4(%arg0: i32, %arg1: i32) -> (i32, i32) {
    %c0_i32 = arith.constant 0 : i32
    %c0_i32_0 = arith.constant 0 : i32
    return %arg0, %c0_i32 : i32, i32
  }
}

</mosaic_0001>

<bundles_post_ra>
// kernel: tpu_custom_call.1
= control target key start
LH: loop header
LB: loop body
LE: loop exit
PB: predicated region body
PF: predicated region fallthrough
CT: control target
= control target key end

     0   :  { %s1273_s0 = inlined_call_operand.vmem [shape: f32[16,128], index: 0, kind: input, shape index: {}]   ;;  %s1274_s1 = inlined_call_operand.hbm [shape: bf16[384,128], index: 1, kind: input, shape index: {}]   ;;  %s1275_s2 = inlined_call_operand.vmem [shape: s32[16,1], index: 2, kind: input, shape index: {}]   ;;  %s1276_s3 = inlined_call_operand.hbm [shape: f32[16,384], index: 3, kind: output, shape index: {0}]   ;;  %s1277_s4 = inlined_call_operand.vmem [shape: f32[16,1], index: 4, kind: output, shape index: {1}]  }
   0x1   :  { %1283 = sst [smem:[#allocation14_spill]] %s1274_s1 }
   0x2   :  { %10 = vsyncpa [#allocation6], 0 }
   0x3   :  { %12 = vsyncpa [#allocation6 + $0x1], 0 }
   0x4   :  { %13 = vsyncpa [#allocation7], 0 }
   0x5   :  { %15 = vsyncpa [#allocation7 + $0x1], 0  ;;  %s1005_s15 = smov 0   ;;  %s1007_s16 = smov 0  }
   0x6   :  { %s1009_s17 = smov 0   ;;  %s1011_s18 = smov 0  }
   0x7   :  { %s1013_s19 = smov 0   ;;  %s1015_s20 = smov 0  }
   0x8   :  { %s1017_s21 = smov 0   ;;  %s1019_s22 = smov 0  }
   0x9   :  { %s1021_s23 = smov 0   ;;  %s1023_s24 = smov 0  }
   0xa   :  { %s1025_s25 = smov 0  }
   0xb LB: > { %1284 = sst [smem:[#allocation11_spill]] %s965_s24  ;;  %s627_s26 = sadd.s32 4294967295, %s969_s25   ;;  %s969_s25 = sphi %s1025_s25, %s21_s25   ;;  %s965_s24 = sphi %s1023_s24, %s1299_s24   ;;  %s961_s23 = sphi %s1021_s23, %s1307_s23   ;;  %s957_s22 = sphi %s1019_s22, %s1297_s22   ;;  %s953_s21 = sphi %s1017_s21, %s1306_s21   ;;  %s949_s20 = sphi %s1015_s20, %s1305_s20   ;;  %s945_s19 = sphi %s1013_s19, %s1304_s19   ;;  %s941_s18 = sphi %s1011_s18, %s1303_s18   ;;  %s937_s17 = sphi %s1009_s17, %s1302_s17   ;;  %s933_s16 = sphi %s1007_s16, %s1301_s16   ;;  %s929_s15 = sphi %s1005_s15, %s1300_s15  }
   0xc   : > { %s628_s27 = sadd.s32 4294967294, %s969_s25   ;;  %s30_s28 = sadd.s32 1, %s961_s23 }
   0xd   : > { %s33_s29 = sadd.s32 1, %s965_s24  ;;  %p31_p0 = scmp.ge.s32.totalorder %s30_s28, 3 }
   0xe   : > { %s66_s30 = sadd.s32 1, %s949_s20  ;;  %p73_p1 = scmp.ne.s32.totalorder %s949_s20, %s945_s19 }
   0xf   : > { %p74_p2 = scmp.eq.s32.totalorder %s969_s25, 0  ;;  %s1309_s28 = smov (%p31_p0, %s30_s28), 0 }
  0x10   : > { %1285 = sst [smem:[#allocation12_spill]] %s1309_s28  ;;  %s1311_s29 = smov (!%p31_p0, %s33_s29), %s965_s24 }
  0x11   : > { %s63_s5 = ssub.s32 %s961_s23, %s1309_s28  ;;  %p1071_p3 = por %p74_p2, %p73_p1 }
  0x12   : > { %p35_p4 = scmp.ge.s32.totalorder %s1311_s29, 2  ;;  %p64_p5 = scmp.eq.s32.totalorder %s63_s5, 0 }
  0x13   : > { %p79_p6 = scmp.ne.s32.totalorder %s945_s19, %s941_s18  ;;  %p80_p7 = scmp.eq.s32.totalorder %s627_s26, 0 }
  0x14   : > { %s1313_s29 = smov (%p35_p4, %s1311_s29), 0  ;;  %s120_s11 = sadd.s32 1, %s937_s17 }
  0x15   : > { %1287 = sst [smem:[#allocation13_spill]] %s1313_s29  ;;  %p1081_p8 = por %p80_p7, %p79_p6 }
  0x16   : > { %s1079_s7 = scalar_select %p64_p5, %s949_s20, %s66_s30  }
  0x17   : > { %s115_s9 = ssub.s32 %s965_s24, %s1313_s29  ;;  %p130_p10 = scmp.ne.s32.totalorder %s937_s17, %s933_s16 }
  0x18   : > { %s117_s10 = sor.u32 %s115_s9, %s63_s5  ;;  %p131_p11 = scmp.eq.s32.totalorder %s627_s26, 5 }
  0x19   : > { %p118_p9 = scmp.eq.s32.totalorder %s117_s10, 0  ;;  %p136_p12 = scmp.ne.s32.totalorder %s933_s16, %s929_s15 }
  0x1a   : > { %p1095_p13 = por %p131_p11, %p130_p10  ;;  %p137_p0 = scmp.eq.s32.totalorder %s628_s27, 5 }
  0x1b   : > { %s1093_s12 = scalar_select %p118_p9, %s937_s17, %s120_s11  }
  0x1c   : > { %s1289_s13 = scalar_select %p1095_p13, 1, 0 }
  0x1d   : > { %p700_p1 = scmp.lt.s32.totalorder %s969_s25, 6  ;;  %p1100_p2 = por %p137_p0, %p136_p12 }
  0x1e   : > { %s190_s18 = sand.u32 1, %s949_s20   ;;  %s657_s5 = sshll.u32 %s961_s23, 10 }
  0x1f   : > { %s1290_s14 = scalar_select %p1100_p2, 1, 0 }
  0x20   : > { %s631_s30 = sshll.u32 %s190_s18, 6  ;;  %s1291_s1 = sld [smem:[#allocation14_spill]] }
  0x21   : > { %s194_s11 = scalar_lea.vmem [#allocation5], %s631_s30  ;;  %p1115_p4 = pnand %p700_p1, %p1071_p3 }
  0x22   : > { %s201_s29 = sshll.u32 %s194_s11, 4  ;;  %s1120_s28 = scalar_lea.sflag [#allocation6], %s190_s18  ;;  %s1111_s29 = int_to_ptr.vmem [resolvable:$true] %s201_s29 }
  0x23   : > { %p819_p7 = pneg %p1115_p4 }
  0x26   : > { %s1109_s26 = scalar_lea.hbm %s1291_s1, %s657_s5  ;;  %s822_s6 = scalar_lea.hbm %s1291_s1, 3072 }
  0x27   : > { %s817_s5 = scalar_lea.hbm %s1109_s26, 1024  ;;  %p823_p3 = scmp.lt.u32.totalorder %s1109_s26, %s1291_s1 }
  0x28   : > { %p818_p6 = scmp.ne.s32.totalorder %s1109_s26, %s817_s5  ;;  %p824_p11 = scmp.lt.u32.totalorder %s822_s6, %s817_s5 }
  0x29   : > { %p826_p0 = scmp.lt.u32.totalorder %s817_s5, %s1109_s26 }
  0x2a   : > { %p820_p9 = pnand %p819_p7, %p818_p6  ;;  %p825_p12 = por %p824_p11, %p823_p3 }
  0x2c   : > { %p821_p10 = pneg %p820_p9  ;;  %p827_p1 = por %p826_p0, %p825_p12 }
  0x2e   : > { %p828_p5 = pnand %p827_p1, %p821_p10 }
  0x30   : > { %831 = shalt.err (!%p828_p5)
}
  0x31   : > { %s832_s18 = scalar_lea.vmem %s1111_s29, 1024  ;;  %s971_s30 = smov [#allocation5]  }
  0x32   : > { %p833_p6 = scmp.ne.s32.totalorder %s1111_s29, %s832_s18  ;;  %s837_s9 = sshll.u32 %s971_s30, 4  ;;  %s838_s9 = int_to_ptr.vmem [resolvable:$false] %s837_s9 }
  0x33   : > { %s839_s10 = scalar_lea.vmem %s838_s9, 2048  ;;  %p840_p13 = scmp.lt.s32.totalorder %s1111_s29, %s838_s9 }
  0x34   : > { %p835_p9 = pnand %p833_p6, %p819_p7  ;;  %p841_p3 = scmp.lt.s32.totalorder %s839_s10, %s832_s18 }
  0x36   : > { %p836_p2 = pneg %p835_p9  ;;  %p842_p11 = por %p841_p3, %p840_p13 }
  0x38   : > { %p843_p12 = pnand %p842_p11, %p836_p2 }
  0x3a   : > { %846 = shalt.err (!%p843_p12)
}
  0x3b   : > { %s972_s5 = smov 64   ;;  %s973_s6 = smov 4  }
  0x3c   : > { %695 = dma.hbm_to_vmem [thread:$0]  (!%p1115_p4), %s1109_s26, 1024, %s1111_s29, %s1120_s28, %s972_s5, %s972_s5, %s973_s6  }
  0x3d   : > { %p216_p5 = scmp.lt.s32.totalorder %s969_s25, 7  ;;  %p1293_p7 = scmp.ge.s32.totalorder %s969_s25, 1 }
  0x3f   : > { %p217_p10 = pnand %p1293_p7, %p216_p5 }
  0x40   : > { %s222_s11 = sand.u32 (!%p217_p10), 1, %s945_s19  }
  0x41   : > { %220 = sbr.rel (%p217_p10) target bundleno = 975 (0x3cf), region = 32  ;;  %s635_s18 = sshll.u32 (!%p217_p10), %s222_s11, 6 }
  0x42   : > { %s223_s30 = scalar_lea.sflag (!%p217_p10), [#allocation6], %s222_s11  ;;  %s1152_s9 = scalar_lea.vmem (!%p217_p10), [#allocation5], %s635_s18 }
  0x48   : > { %920 = dma.done.wait (%p1081_p8), %s223_s30, 1024  }
  0x49   : > { %922 = vsyncadd (%p1081_p8), %s223_s30, 4294966272  ;;  %s1281_s28 = sand.u32 1, %s933_s16   ;;  %p263_p13 = scmp.lt.s32.totalorder %s957_s22, 1 }
  0x4a   : > { %s1162_s29 = sshll.u32 %s1281_s28, 3  ;;  %p640_p8 = scmp.ne.s32.totalorder %s953_s21, 0 }
  0x4b   : > { %s264_s26 = scalar_select %p263_p13, %s957_s22, 1 }
  0x4c   : > { %s256_s24 = scalar_lea.vmem [#allocation8], %s1162_s29  ;;  %280 = sbr.rel (%p640_p8) target bundleno = 83 (0x53), region = 40  ;;  %vm281_vm0 = vcmask (!%p640_p8), 7168   ;;  %v974_v0 = vmov (!%p640_p8), -inf   ;;  %v975_v1 = vmov (!%p640_p8), 0.0  }
  0x4d   : > { %s1165_s27 = sshll.u32 %s264_s26, 3  ;;  %282 = vst.msk [vmem:[#allocation2] sm:$0xff] (!%p640_p8), %vm281_vm0, %v974_v0  ;;  %283 = vst.msk [vmem:[#allocation3] sm:$0xff] (!%p640_p8), %vm281_vm0, %v975_v1 }
  0x4e   : > { %s266_s8 = scalar_lea.vmem %s1273_s0, %s1165_s27  ;;  %s271_s18 = scalar_lea.vmem %s1275_s2, %s1165_s27  ;;  %284 = vst.msk [vmem:[#allocation4] sm:$0xff] (!%p640_p8), %vm281_vm0, %v975_v1 }
  0x4f   : > { %s275_s28 = scalar_lea.vmem %s1277_s4, %s1165_s27 }
  0x53 PF: > { %v285_v2 = vld [vmem:[%s266_s8] sm:$0xff]  ;;  %v976_v4 = vmov 0.0   ;;  %v799_v5 = vld [vmem:[%s1152_s9] sm:$0xff]   ;;  %v801_v7 = vld [vmem:[%s1152_s9 + $0x10] sm:$0xff]   ;;  %vm977_vm1 = vmmov 0   ;;  %v978_v11 = vmov 0   ;;  %v416_v27 = vlaneseq }
  0x54   : > { %v286_v3 = vmul.f32 %v285_v2, %v285_v2  ;;  %667 = vmatprep.subr.bf16.mxu0 %v976_v4  ;;  %v800_v6 = vld [vmem:[%s1152_s9 + $0x8] sm:$0xff]   ;;  %683 = vmatprep.mubr.msk.bf16.mxu0 %vm977_vm1, %v976_v4  ;;  %v802_v8 = vld [vmem:[%s1152_s9 + $0x18] sm:$0xff]   ;;  %v803_v9 = vld [vmem:[%s1152_s9 + $0x20] sm:$0xff]   ;;  %s650_s10 = sshll.u32 %s953_s21, 7  ;;  %vm452_vm6 = vcmask 7168   ;;  %p652_p2 = scmp.ne.s32.totalorder %s953_s21, 2 }
  0x55   : > { %668 = vmatpush3.bf16.xpose.msra.mxu0 %v799_v5  ;;  %v414_v10 = vld [vmem:[%s271_s18] sm:$0xff]  ;;  %797 = vset.pattern.permute.xlu0 %v978_v11  ;;  %v805_v13 = vld [vmem:[%s1152_s9 + $0x30] sm:$0xff]   ;;  %v806_v14 = vld [vmem:[%s1152_s9 + $0x38] sm:$0xff]   ;;  %v417_v29 = vand.u32 127, %v416_v27  ;;  %v418_v30 = vstv %s650_s10 }
  0x56   : > { %287 = vadd.xlane.f32.xlu0 %v286_v3  ;;  %669 = vmatprep.subr.bf16.mxu0 %v976_v4  ;;  %v804_v12 = vld [vmem:[%s1152_s9 + $0x28] sm:$0xff]   ;;  %v454_v51 = vld [vmem:[#allocation4] sm:$0xff]  ;;  %v439_v63 = vld [vmem:[#allocation3] sm:$0xff] }
  0x57   : > { %798 = vset.pattern.permute.xlu1 %v978_v11  ;;  %v419_v31 = vadd.s32 %v418_v30, %v417_v29  ;;  %v432_v50 = vld [vmem:[#allocation2] sm:$0xff] }
  0x5d   : > { %670 = vmatpush3.bf16.xpose.msra.mxu0 %v800_v6 }
  0x5e   : > { %671 = vmatprep.subr.bf16.mxu0 %v976_v4 }
  0x65   : > { %672 = vmatpush3.bf16.xpose.msra.mxu0 %v801_v7 }
  0x66   : > { %673 = vmatprep.subr.bf16.mxu0 %v976_v4 }
  0x6c   : > { %421 = vperm.xlu0 %797, %v414_v10  }
  0x6d   : > { %674 = vmatpush3.bf16.xpose.msra.mxu0 %v802_v8 }
  0x6e   : > { %675 = vmatprep.subr.bf16.mxu0 %v976_v4 }
  0x75   : > { %676 = vmatpush3.bf16.xpose.msra.mxu0 %v803_v9 }
  0x76   : > { %677 = vmatprep.subr.bf16.mxu0 %v976_v4 }
  0x7d   : > { %678 = vmatpush3.bf16.xpose.msra.mxu0 %v804_v12 }
  0x7e   : > { %679 = vmatprep.subr.bf16.mxu0 %v976_v4 }
  0x85   : > { %680 = vmatpush3.bf16.xpose.msra.mxu0 %v805_v13 }
  0x86   : > { %681 = vmatprep.subr.bf16.mxu0 %v976_v4 }
  0x8d   : > { %682 = vmatpush3.bf16.xpose.msra.mxu0 %v806_v14 }
  0xe3   : > { %v288_v15 = vpop.xlane.xlu0 %287 }
  0xe4   : > { %v289_v16 = vmax.f32 %v288_v15, 1e-24 }
  0xe6   : > { %807 = vrsqrt.f32 %v289_v16 }
  0xeb   : > { %v422_v32 = vpop.permute.xlu0 %421 }
  0xec   : > { %vm423_vm2 = vcmp.eq.s32.totalorder %v419_v31, %v422_v32 }
  0xed   : > { %v651_v36 = vsel %vm423_vm2, 1.0, %v976_v4 }
  0xee   : > { %v427_v41 = vsub.f32 1.0, %v651_v36 }
  0xf0   : > { %v808_v17 = vpop.eup %807 }
  0xf1   : > { %v291_v18 = vmul.f32 %v808_v17, %v285_v2 }
  0xf3   : > { %v292_v19 = vpack.c.bf16 %v291_v18, %v291_v18 }
  0xf5   : > { %684 = vmatmul.mubr.bf16.vlgmr.msra.gmra.mrb[0].mxu0 %v292_v19 }
 0x1c8   : > { %v391_v20 = vpop.f32.mrb[0].mxu0 }
 0x1c9   : > { %v397_v21 = vmul.f32 %v391_v20, %v391_v20  ;;  %v685_v22 = vpop.f32.mrb[1].mxu0  ;;  %v408_v39 = vmul.f32 0.87758255, %v391_v20  ;;  %v649_v43 = vadd.f32 -0.23971277, %v391_v20  ;;  %v428_v45 = vmul.f32 %v427_v41, %v391_v20 }
 0x1ca   : > { %v394_v24 = vpop.f32.mrb[2].mxu0  ;;  %vm411_vm5 = vcmp.gt.f32.partialorder %v391_v20, -0.87758255 }
 0x1cb   : > { %v398_v23 = vsub.f32 1.0, %v397_v21  ;;  %v686_v25 = vpop.f32.mrb[3].mxu0 }
 0x1cd   : > { %v399_v26 = vmax.f32 %v398_v23, 0.0 }
 0x1cf   : > { %v400_v28 = vmin.f32 %v399_v26, 1.0 }
 0x1d1   : > { %809 = vrsqrt.f32 %v400_v28  ;;  %vm403_vm3 = vcmp.eq.f32.partialorder %v400_v28, inf  ;;  %v406_v35 = vand.u32 2147483648, %v400_v28  ;;  %vm405_vm4 = vcmp.eq.f32.partialorder %v400_v28, 0.0 }
 0x1db   : > { %v810_v33 = vpop.eup %809 }
 0x1dc   : > { %v402_v34 = vmul.f32 %v810_v33, %v400_v28 }
 0x1de   : > { %v404_v37 = vsel %vm403_vm3, %v400_v28, %v402_v34 }
 0x1df   : > { %v407_v38 = vsel %vm405_vm4, %v406_v35, %v404_v37 }
 0x1e0   : > { %v409_v40 = vmul.f32 0.47942555, %v407_v38 }
 0x1e2   : > { %v410_v42 = vsub.f32 %v408_v39, %v409_v40 }
 0x1e4   : > { %v413_v44 = vsel %vm411_vm5, %v410_v42, %v649_v43 }
 0x1e5   : > { %v426_v46 = vmul.f32 %v651_v36, %v413_v44 }
 0x1e7   : > { %v429_v47 = vadd.f32 %v428_v45, %v426_v46 }
 0x1e9   : > { %v430_v48 = vmul.f32 30.0, %v429_v47 }
 0x1eb   : > { %433 = vmax.xlane.f32.xlu1 %v430_v48  ;;  %431 = vst [vmem:[%s256_s24] sm:$0xff] %v430_v48  ;;  %v455_v49 = vsel %vm423_vm2, %v430_v48, 0.0 }
 0x1ec   : > { %456 = vadd.xlane.f32.xlu0 %v455_v49 }
 0x278   : > { %v434_v52 = vpop.xlane.xlu1 %433 }
 0x279   : > { %v435_v53 = vmax.f32 %v432_v50, %v434_v52  ;;  %v457_v54 = vpop.xlane.xlu0 %456 }
 0x27a   : > { %v458_v55 = vadd.f32 %v457_v54, %v454_v51 }
 0x27b   : > { %v436_v56 = vsub.f32 %v432_v50, %v435_v53  ;;  %460 = vst.msk [vmem:[#allocation2] sm:$0xff] %vm452_vm6, %v435_v53  ;;  %443 = vperm.xlu1 %798, %v435_v53  }
 0x27c   : > { %459 = vst.msk [vmem:[#allocation4] sm:$0xff] %vm452_vm6, %v458_v55 }
 0x27d   : > { %v437_v61 = vmul.f32 1.442695, %v436_v56 }
 0x282   : > { %v465_v5 = vld [vmem:[#allocation2] sm:$0xff] (!%p652_p2) }
 0x283   : > { %v470_v7 = vld [vmem:[#allocation4] sm:$0xff] (!%p652_p2) }
 0x2fa   : > { %v444_v57 = vpop.permute.xlu1 %443 }
 0x2fb   : > { %v446_v58 = vsub.f32 %v430_v48, %v444_v57 }
 0x2fd   : > { %v447_v59 = vmul.f32 1.442695, %v446_v58 }
 0x2ff   : > { %811 = vpow2.f32 %v447_v59 }
 0x300   : > { %813 = vpow2.f32 %v437_v61 }
 0x309   : > { %v812_v60 = vpop.eup %811 }
 0x30a   : > { %449 = vadd.xlane.f32.xlu1 %v812_v60  ;;  %v814_v62 = vpop.eup %813 }
 0x30b   : > { %v440_v0 = vmul.f32 %v814_v62, %v439_v63 }
 0x394   : > { %464 = sbr.rel (%p652_p2) target bundleno = 948 (0x3b4), region = 44 }
 0x397   : > { %v450_v1 = vpop.xlane.xlu1 %449 }
 0x398   : > { %v451_v2 = vadd.f32 %v450_v1, %v440_v0 }
 0x39a   : > { %453 = vst.msk [vmem:[#allocation3] sm:$0xff] %vm452_vm6, %v451_v2 }
 0x3a1   : > { %v466_v3 = vld [vmem:[#allocation3] sm:$0xff] }
 0x3a2   : > { %815 = vlog2.f32 %v466_v3 }
 0x3ac   : > { %v816_v4 = vpop.eup %815 }
 0x3ad   : > { %v468_v6 = vmul.f32 0.6931472, %v816_v4 }
 0x3af   : > { %v469_v8 = vadd.f32 %v468_v6, %v465_v5 }
 0x3b1   : > { %v471_v9 = vsub.f32 %v469_v8, %v470_v7 }
 0x3b3   : > { %472 = vst.msk [vmem:[%s275_s28] sm:$0xff] %vm452_vm6, %v471_v9 }
 0x3b4 PF: > { %s687_s8 = smul.u32 3, %s957_s22  ;;  %s493_s6 = sshll.u32 %s256_s24, 4  ;;  %s1213_s6 = int_to_ptr.vmem [resolvable:$true] %s493_s6 }
 0x3b5   : > { %s1294_s27 = sand.u32 1, %s933_s16   ;;  %s847_s10 = scalar_lea.vmem %s1213_s6, 128 }
 0x3b6   : > { %s489_s11 = sadd.s32 %s953_s21, %s687_s8  ;;  %s474_s26 = scalar_lea.sflag [#allocation7], %s1294_s27 }
 0x3b7   : > { %s654_s18 = sshll.u32 %s489_s11, 7  ;;  %p848_p4 = scmp.ne.s32.totalorder %s1213_s6, %s847_s10 }
 0x3b8   : > { %s491_s28 = scalar_lea.hbm %s1276_s3, %s654_s18  ;;  %p1295_p0 = scmp.ne.s32.totalorder %s1289_s13, 0 }
 0x3b9   : > { %s979_s22 = smov [#allocation8]  }
 0x3ba   : > { %p849_p1 = pnand %p848_p4, %p1295_p0  ;;  %s851_s24 = sshll.u32 %s979_s22, 4  ;;  %s852_s24 = int_to_ptr.vmem [resolvable:$false] %s851_s24 }
 0x3bb   : > { %s853_s21 = scalar_lea.vmem %s852_s24, 256  ;;  %p854_p9 = scmp.lt.s32.totalorder %s1213_s6, %s852_s24 }
 0x3bc   : > { %p850_p6 = pneg %p849_p1  ;;  %p855_p3 = scmp.lt.s32.totalorder %s853_s21, %s847_s10 }
 0x3be   : > { %p856_p11 = por %p855_p3, %p854_p9 }
 0x3c0   : > { %p857_p12 = pnand %p856_p11, %p850_p6 }
 0x3c2   : > { %860 = shalt.err (!%p857_p12)
}
 0x3c3   : > { %s861_s29 = scalar_lea.hbm %s491_s28, 128  ;;  %s865_s8 = scalar_lea.hbm %s1276_s3, 768 }
 0x3c4   : > { %p862_p5 = scmp.ne.s32.totalorder %s491_s28, %s861_s29  ;;  %p866_p13 = scmp.lt.u32.totalorder %s491_s28, %s1276_s3 }
 0x3c5   : > { %p867_p8 = scmp.lt.u32.totalorder %s865_s8, %s861_s29  ;;  %p869_p4 = scmp.lt.u32.totalorder %s861_s29, %s491_s28 }
 0x3c6   : > { %p863_p7 = pnand %p862_p5, %p1295_p0 }
 0x3c7   : > { %p868_p2 = por %p867_p8, %p866_p13 }
 0x3c8   : > { %p864_p10 = pneg %p863_p7 }
 0x3c9   : > { %p870_p1 = por %p869_p4, %p868_p2 }
 0x3cb   : > { %p871_p6 = pnand %p870_p1, %p864_p10 }
 0x3cd   : > { %874 = shalt.err (!%p871_p6)
}
 0x3ce   : > { %690 = dma.vmem_to_hbm [thread:$0]  (%p1295_p0), %s1213_s6, 128, %s491_s28, %s474_s26  }
 0x3cf PF: > { %p701_p9 = scmp.ge.s32.totalorder %s969_s25, 2  ;;  %s508_s30 = sand.u32 1, %s929_s15  }
 0x3d0   : > { %p1296_p3 = scmp.ne.s32.totalorder %s1290_s14, 0  ;;  %s509_s1 = scalar_lea.sflag [#allocation7], %s508_s30 }
 0x3d2   : > { %p697_p11 = pnand %p701_p9, %p1296_p3 }
 0x3d4   : > { %924 = dma.done.wait (!%p697_p11), %s509_s1, 128  }
 0x3d5   : > { %926 = vsyncadd (!%p697_p11), %s509_s1, 4294967168  ;;  %s21_s25 = sadd.s32 1, %s969_s25   ;;  %s1297_s22 = sld [smem:[#allocation11_spill]] }
 0x3d6   : > { %p18_p12 = scmp.ge.s32.totalorder %s21_s25, 8   ;;  %s1298_s13 = sld [smem:[#allocation12_spill]] }
 0x3d7   : > { %s1299_s24 = sld [smem:[#allocation13_spill]]  ;;  %s1300_s15 = smov %s933_s16 }
 0x3d8   : > { %s1301_s16 = smov %s937_s17  ;;  %s1302_s17 = smov %s1093_s12 }
 0x3d9   : > { %s1303_s18 = smov %s945_s19  ;;  %s1304_s19 = smov %s949_s20 }
 0x3da   : > { %s1305_s20 = smov %s1079_s7  ;;  %s1306_s21 = smov %s961_s23 }
 0x3db   :  { %20 = sbr.rel (!%p18_p12) target bundleno = 11 (0xb), region = 103 }
 0x3dc   : > { %s1307_s23 = smov %s1298_s13 }
 0x3e2   :  { %521 = vsyncpa [#allocation6], 1 }
 0x3e3   :  { %523 = vsyncpa [#allocation6 + $0x1], 1 }
 0x3e4   :  { %524 = vsyncpa [#allocation7], 1 }
 0x3e5   :  { %526 = vsyncpa [#allocation7 + $0x1], 1 }

</bundles_post_ra>
